<compile_context>
chip_gen: v6e
topology: v6e:2x2x1
jax: 0.10.0
libtpu: 0.0.40
codegen_flags: <defaults>
</compile_context>

<pallas_src>
import functools

import jax
import jax.numpy as jnp
from jax.experimental import pallas as pl
from jax.experimental.pallas import tpu as pltpu


def _round_up(x, m):
    return ((x + m - 1) // m) * m


def _round_down(x, m):
    return (x // m) * m


def _vmem_capacity_bytes():
    """Physical VMEM bytes; conservative (v7x-class) default if unqueryable."""
    try:
        info = pltpu.get_tpu_info()
        return int(getattr(info, "vmem_capacity_bytes", 64 << 20))
    except Exception:
        return 64 << 20


def _budgets():
    """(per-step logits byte target, usable VMEM cap) for this generation."""
    vmem = _vmem_capacity_bytes()
    if vmem >= (100 << 20):          # v5e / v6e: 128 MiB physical VMEM
        return (2 << 20), (96 << 20)
    # v7x-class (64 MiB physical) or unknown: faster HBM => bigger per-step
    # target, tighter VMEM cap (leave headroom for compiler scratch).
    return (4 << 20), min(44 << 20, max(24 << 20, vmem - (16 << 20)))


def _largest_divisor_leq(n, k):
    k = max(1, min(n, k))
    for d in range(k, 0, -1):
        if n % d == 0:
            return d
    return 1


def _choose_tiling(N, C, L, itemsize, step_target, vmem_cap):
    """Pick (lane_tile, images_per_block, num_lane_tiles, physical_C)."""
    lane = 128
    pack = max(1, 32 // itemsize)            # sub-32-bit dtypes pack on sublanes
    c_phys = _round_up(C, pack)              # physical sublanes of the class axis
    # Per-lane per-image bytes of ONE pipeline buffer:
    #   logits tile + int32 target tile (1 row -> 8 sublanes) + f32 out tile.
    per_lane_buf = c_phys * itemsize + 8 * 4 + 8 * 4
    max_lanes = max(lane, _round_down((vmem_cap - (8 << 20)) // (2 * per_lane_buf), lane))

    Lp = _round_up(L, lane)
    if Lp <= max_lanes:
        tl = Lp                              # whole image in one lane tile
    else:
        tl = max(lane, min(max_lanes,
                           _round_down(step_target // (c_phys * itemsize), lane)))

    if tl == Lp:
        per_image_bytes = c_phys * tl * itemsize
        nb_ideal = min(N, max(1, step_target // per_image_bytes),
                       max(1, max_lanes // tl))
        nb = _largest_divisor_leq(N, nb_ideal)
    else:
        nb = 1

    num_l = -(-L // tl)
    return tl, nb, num_l, c_phys


def _ce_kernel(logits_ref, target_ref, out_ref, *, n_pixels, lane_tile, accumulate):
    """One (batch-group, lane-tile) grid step.

    logits_ref: (NB, C, TL)  original dtype (classes on sublanes, pixels on lanes)
    target_ref: (NB, 1, TL)  int32
    out_ref:    (NB, 1, TL)  f32 (per-pixel loss, or resident accumulator)
    """
    l = pl.program_id(1)

    x = logits_ref[...].astype(jnp.float32)                  # (NB, C, TL)
    t = target_ref[...]                                      # (NB, 1, TL)

    # Numerically stable log-sum-exp over the class (sublane) axis.
    m = jnp.max(x, axis=1, keepdims=True)                    # (NB, 1, TL)
    lse = m + jnp.log(jnp.sum(jnp.exp(x - m), axis=1, keepdims=True))

    # Target-class logit via one-hot compare along the class axis (no gather).
    cls = jax.lax.broadcasted_iota(jnp.int32, x.shape, 1)    # (NB, C, TL)
    picked = jnp.sum(jnp.where(cls == t, x, 0.0), axis=1, keepdims=True)

    loss = lse - picked                                      # per-pixel NLL

    # Mask lanes past the true pixel count (ragged tail handled here; the
    # wrapper never pads logits or targets, so OOB lanes may hold garbage).
    lane_idx = jax.lax.broadcasted_iota(jnp.int32, loss.shape, 2)
    valid = (l * lane_tile + lane_idx) < n_pixels
    loss = jnp.where(valid, loss, 0.0)

    if accumulate:
        @pl.when(l == 0)
        def _():
            out_ref[...] = jnp.zeros_like(out_ref)
        out_ref[...] += loss
    else:
        out_ref[...] = loss


def cross_entropy_loss(res, target):
    """res: (N, C, H, W) float logits; target: (N, H, W) integer class indices.

    Returns the scalar mean cross-entropy, matching
    nn.CrossEntropyLoss()(res, target.long()).
    NOTE: no ignore_index support (PyTorch default -100 never fires for valid
    targets in [0, C)); the mean is over all N*H*W pixels.
    """
    N, C, H, W = res.shape
    L = H * W
    M = N * L
    itemsize = jnp.dtype(res.dtype).itemsize

    # Free reshapes only (no transpose, no dtype change, no padding).
    logits = res.reshape(N, C, L)
    tgt = target.reshape(N, 1, L).astype(jnp.int32)          # .long() semantics

    step_target, vmem_cap = _budgets()
    tl, nb, num_l, c_phys = _choose_tiling(N, C, L, itemsize, step_target, vmem_cap)
    grid = (N // nb, num_l)

    # Accumulate across the lane axis only when it is tiled AND the batch axis
    # alone already gives >=2 parallel grid steps; otherwise emit per-tile
    # per-pixel losses so BOTH axes are "parallel" (v7x dual-core, batch-1).
    accumulate = (num_l > 1) and (grid[0] >= 2)

    kernel = functools.partial(_ce_kernel, n_pixels=L, lane_tile=tl,
                               accumulate=accumulate)

    if accumulate:
        out_shape = jax.ShapeDtypeStruct((N, 1, tl), jnp.float32)
        out_spec = pl.BlockSpec((nb, 1, tl), lambda n, l: (n, 0, 0))
        dims = ("parallel", "arbitrary")
        out_bytes = N * tl * 4
    else:
        out_shape = jax.ShapeDtypeStruct((N, 1, num_l * tl), jnp.float32)
        out_spec = pl.BlockSpec((nb, 1, tl), lambda n, l: (n, 0, l))
        dims = ("parallel", "parallel")
        out_bytes = N * num_l * tl * 4

    # VMEM budget: double-buffered (logits + target + out) blocks, class axis
    # counted at its physical sublane-padded size.
    buf_bytes = nb * tl * (c_phys * itemsize + 8 * 4 + 8 * 4)
    vmem_limit = int(min(vmem_cap, max(32 << 20, 2 * buf_bytes + (6 << 20))))

    cost = pl.CostEstimate(
        flops=int(5 * M * C),
        transcendentals=int(M * C + M),
        bytes_accessed=int(N * C * L * itemsize + N * L * 4 + out_bytes),
    )

    out = pl.pallas_call(
        kernel,
        out_shape=out_shape,
        grid_spec=pltpu.PrefetchScalarGridSpec(
            num_scalar_prefetch=0,
            grid=grid,
            in_specs=[
                pl.BlockSpec((nb, C, tl), lambda n, l: (n, 0, l)),
                pl.BlockSpec((nb, 1, tl), lambda n, l: (n, 0, l)),
            ],
            out_specs=out_spec,
        ),
        compiler_params=pltpu.CompilerParams(
            dimension_semantics=dims,
            vmem_limit_bytes=vmem_limit,
        ),
        cost_estimate=cost,
    )(logits, tgt)

    # Masked lanes were written as exact zeros, so a plain sum is correct.
    return jnp.sum(out) / jnp.float32(M)


def _reference(res, target):
    N, C, H, W = res.shape
    x = jnp.transpose(res, (0, 2, 3, 1)).reshape(-1, C).astype(jnp.float32)
    t = target.reshape(-1).astype(jnp.int32)
    logp = jax.nn.log_softmax(x, axis=-1)
    nll = -jnp.take_along_axis(logp, t[:, None], axis=-1)[:, 0]
    return jnp.mean(nll)


if __name__ == "__main__":
    key = jax.random.PRNGKey(0)
    k1, k2 = jax.random.split(key)

    N, C, H, W = 2, 4, 16, 16
    res = jax.random.normal(k1, (N, C, H, W), dtype=jnp.float32)
    target = jax.random.randint(k2, (N, H, W), 0, C, dtype=jnp.int32)

    loss = cross_entropy_loss(res, target)
    loss = jax.block_until_ready(loss)

    ref = _reference(res, target)
    assert jnp.abs(loss - ref) < 1e-4, (loss, ref)

    print("KERNEL_OK")
</pallas_src>

<mosaic_0001>
module attributes {stable_mosaic.version = 11 : i64} {
  func.func @_ce_kernel(%arg0: i32, %arg1: i32, %arg2: memref<2x4x256xf32, #tpu.memory_space<vmem>>, %arg3: memref<2x1x256xi32, #tpu.memory_space<vmem>>, %arg4: memref<2x1x256xf32, #tpu.memory_space<vmem>>) attributes {dimension_semantics = [#tpu.dimension_semantics<parallel>, #tpu.dimension_semantics<parallel>], iteration_bounds = array<i64: 1, 1>, scalar_prefetch = 0 : i64, scratch_operands = 0 : i64, tpu.core_type = #tpu.core_type<tc>, window_params = [{transform_indices = @transform_0, window_bounds = array<i64: 2, 4, 256>}, {transform_indices = @transform_1, window_bounds = array<i64: 2, 1, 256>}, {transform_indices = @transform_2, window_bounds = array<i64: 2, 1, 256>}]} {
    %c0 = arith.constant 0 : index
    %c0_0 = arith.constant 0 : index
    %c0_1 = arith.constant 0 : index
    %0 = vector.load %arg2[%c0, %c0_0, %c0_1] : memref<2x4x256xf32, #tpu.memory_space<vmem>>, vector<2x4x256xf32>
    %c0_2 = arith.constant 0 : index
    %c0_3 = arith.constant 0 : index
    %c0_4 = arith.constant 0 : index
    %1 = vector.load %arg3[%c0_2, %c0_3, %c0_4] : memref<2x1x256xi32, #tpu.memory_space<vmem>>, vector<2x1x256xi32>
    %cst = arith.constant dense<0xFF800000> : vector<2x256xf32>
    %2 = vector.multi_reduction <maximumf>, %0, %cst [1] : vector<2x4x256xf32> to vector<2x256xf32>
    %3 = vector.shape_cast %2 : vector<2x256xf32> to vector<2x1x256xf32>
    %4 = vector.broadcast %3 : vector<2x1x256xf32> to vector<2x4x256xf32>
    %5 = arith.subf %0, %4 : vector<2x4x256xf32>
    %6 = math.exp %5 : vector<2x4x256xf32>
    %cst_5 = arith.constant dense<0.000000e+00> : vector<2x256xf32>
    %7 = vector.multi_reduction <add>, %6, %cst_5 [1] : vector<2x4x256xf32> to vector<2x256xf32>
    %8 = vector.shape_cast %7 : vector<2x256xf32> to vector<2x1x256xf32>
    %9 = math.log %8 : vector<2x1x256xf32>
    %10 = arith.addf %3, %9 : vector<2x1x256xf32>
    %11 = tpu.iota {dimensions = array<i32: 1>} : vector<2x4x256xi32>
    %12 = vector.broadcast %1 : vector<2x1x256xi32> to vector<2x4x256xi32>
    %13 = arith.cmpi eq, %11, %12 : vector<2x4x256xi32>
    %cst_6 = arith.constant 0.000000e+00 : f32
    %14 = vector.broadcast %cst_6 : f32 to vector<2x4x256xf32>
    %15 = arith.select %13, %0, %14 : vector<2x4x256xi1>, vector<2x4x256xf32>
    %cst_7 = arith.constant dense<0.000000e+00> : vector<2x256xf32>
    %16 = vector.multi_reduction <add>, %15, %cst_7 [1] : vector<2x4x256xf32> to vector<2x256xf32>
    %17 = vector.shape_cast %16 : vector<2x256xf32> to vector<2x1x256xf32>
    %18 = arith.subf %10, %17 : vector<2x1x256xf32>
    %19 = tpu.iota {dimensions = array<i32: 2>} : vector<2x1x256xi32>
    %c256_i32 = arith.constant 256 : i32
    %20 = arith.muli %arg1, %c256_i32 : i32
    %21 = vector.broadcast %20 : i32 to vector<2x1x256xi32>
    %22 = arith.addi %21, %19 : vector<2x1x256xi32>
    %c256_i32_8 = arith.constant 256 : i32
    %23 = vector.broadcast %c256_i32_8 : i32 to vector<2x1x256xi32>
    %24 = arith.cmpi slt, %22, %23 : vector<2x1x256xi32>
    %cst_9 = arith.constant 0.000000e+00 : f32
    %25 = vector.broadcast %cst_9 : f32 to vector<2x1x256xf32>
    %26 = arith.select %24, %18, %25 : vector<2x1x256xi1>, vector<2x1x256xf32>
    %c0_10 = arith.constant 0 : index
    %c0_11 = arith.constant 0 : index
    %c0_12 = arith.constant 0 : index
    %27 = vector.load %arg4[%c0_10, %c0_11, %c0_12] : memref<2x1x256xf32, #tpu.memory_space<vmem>>, vector<2x1x256xf32>
    tpu.vector_store %arg4[%c0_10, %c0_11, %c0_12], %26 {strides = array<i32>} : memref<2x1x256xf32, #tpu.memory_space<vmem>>, vector<2x1x256xf32>,
    return
  }
  func.func @transform_0(%arg0: i32, %arg1: i32) -> (i32, i32, i32) {
    %c0_i32 = arith.constant 0 : i32
    %c0_i32_0 = arith.constant 0 : i32
    return %arg0, %c0_i32, %arg1 : i32, i32, i32
  }
  func.func @transform_1(%arg0: i32, %arg1: i32) -> (i32, i32, i32) {
    %c0_i32 = arith.constant 0 : i32
    %c0_i32_0 = arith.constant 0 : i32
    return %arg0, %c0_i32, %arg1 : i32, i32, i32
  }
  func.func @transform_2(%arg0: i32, %arg1: i32) -> (i32, i32, i32) {
    %c0_i32 = arith.constant 0 : i32
    %c0_i32_0 = arith.constant 0 : i32
    return %arg0, %c0_i32, %arg1 : i32, i32, i32
  }
}

</mosaic_0001>

<bundles_post_ra>
// kernel: tpu_custom_call.1
= control target key start
LH: loop header
LB: loop body
LE: loop exit
PB: predicated region body
PF: predicated region fallthrough
CT: control target
= control target key end

     0   :  { %7 = vsyncpa [#allocation3], 0  ;;  %s446_s0 = inlined_call_operand.hbm [shape: f32[2,4,256], index: 0, kind: input, shape index: {}]   ;;  %s447_s1 = inlined_call_operand.hbm [shape: s32[2,1,256], index: 1, kind: input, shape index: {}]   ;;  %s448_s2 = inlined_call_operand.hbm [shape: f32[2,1,256], index: 2, kind: output, shape index: {}]  }
   0x1   :  { %8 = vsyncpa [#allocation6], 0 }
   0x2   :  { %9 = vsyncpa [#allocation4], 0  ;;  %s358_s9 = smov [#allocation2]  }
   0x3   :  { %s15_s10 = sshll.u32 %s358_s9, 4  ;;  %s16_s10 = int_to_ptr.vmem [resolvable:$true] %s15_s10 }
   0x4   :  { %s300_s11 = scalar_lea.vmem %s16_s10, 256  ;;  %p305_p1 = scmp.lt.s32.totalorder %s16_s10, %s16_s10 }
   0x5   :  { %p301_p0 = scmp.ne.s32.totalorder %s16_s10, %s300_s11  ;;  %p306_p2 = scmp.lt.s32.totalorder %s300_s11, %s300_s11 }
   0x7   :  { %p307_p3 = por %p306_p2, %p305_p1 }
   0x9   :  { %p308_p4 = pnand %p307_p3, %p301_p0 }
   0xb   :  { %311 = shalt.err (!%p308_p4)
}
   0xc   :  { %s359_s12 = smov 128   ;;  %s360_s13 = smov 8  }
   0xd   :  { %21 = dma.hbm_to_vmem [thread:$0]  %s446_s0, 256, %s16_s10, [#allocation3], %s359_s12, %s359_s12, %s360_s13  }
   0xe   :  { %s361_s16 = smov [#allocation5]  }
   0xf   :  { %s27_s17 = sshll.u32 %s361_s16, 4  ;;  %s28_s17 = int_to_ptr.vmem [resolvable:$true] %s27_s17 }
  0x10   :  { %s320_s18 = scalar_lea.vmem %s28_s17, 64  ;;  %p325_p6 = scmp.lt.s32.totalorder %s28_s17, %s28_s17 }
  0x11   :  { %p321_p5 = scmp.ne.s32.totalorder %s28_s17, %s320_s18  ;;  %p326_p7 = scmp.lt.s32.totalorder %s320_s18, %s320_s18 }
  0x13   :  { %p327_p8 = por %p326_p7, %p325_p6 }
  0x15   :  { %p328_p9 = pnand %p327_p8, %p321_p5 }
  0x17   :  { %331 = shalt.err (!%p328_p9)
}
  0x18   :  { %s362_s19 = smov 32   ;;  %s363_s20 = smov 2  }
  0x19   :  { %33 = dma.hbm_to_vmem [thread:$0]  %s447_s1, 64, %s28_s17, [#allocation6], %s362_s19, %s362_s19, %s363_s20  }
  0x1a   :  { %352 = dma.done.wait [#allocation3], 256  }
  0x1b   :  { %353 = vsyncadd [#allocation3], 4294967040 }
  0x1c   :  { %354 = dma.done.wait [#allocation6], 64  }
  0x1d   :  { %355 = vsyncadd [#allocation6], 4294967232  ;;  %vm50_vm0 = vcmask 1043456   ;;  %v40_v0 = vld [vmem:[#allocation2] sm:$0xff]  ;;  %v390_v1 = vld [vmem:[#allocation2 + $0x8] sm:$0xff]  ;;  %v139_v34 = vlaneseq  ;;  %s365_s0 = smov [#allocation7]  }
  0x1e   :  { %v46_v2 = vcombine.high %v40_v0, %v40_v0  ;;  %v51_v3 = vsel %vm50_vm0, %v40_v0, -inf  ;;  %v395_v5 = vcombine.high %v390_v1, %v390_v1  ;;  %v65_v6 = vsel %vm50_vm0, %v390_v1, -inf  ;;  %v42_v41 = vld [vmem:[#allocation5] sm:$0x3]  ;;  %v43_v44 = vld [vmem:[#allocation5 + $0x2] sm:$0x3] }
  0x1f   :  { %v52_v4 = vrot.slane %v51_v3, 4  ;;  %v66_v8 = vrot.slane %v65_v6, 4  ;;  %v416_v38 = vshrl.u32 %v139_v34, 7  ;;  %vm248_vm5 = vcmp.lt.s32.totalorder %v139_v34, 256  ;;  %s257_s1 = sshll.u32 %s365_s0, 4  ;;  %s258_s1 = int_to_ptr.vmem [resolvable:$true] %s257_s1 }
  0x20   :  { %v58_v7 = vsel %vm50_vm0, %v46_v2, -inf  ;;  %v72_v12 = vsel %vm50_vm0, %v395_v5, -inf  ;;  %s332_s23 = scalar_lea.vmem %s258_s1, 64  ;;  %p337_p11 = scmp.lt.s32.totalorder %s258_s1, %s258_s1 }
  0x21   :  { %v53_v9 = vmax.f32 %v51_v3, %v52_v4  ;;  %v59_v10 = vrot.slane %v58_v7, 4  ;;  %v67_v11 = vmax.f32 %v65_v6, %v66_v8  ;;  %v73_v16 = vrot.slane %v72_v12, 4  ;;  %p333_p10 = scmp.ne.s32.totalorder %s258_s1, %s332_s23  ;;  %p338_p12 = scmp.lt.s32.totalorder %s332_s23, %s332_s23 }
  0x22   :  { %v143_v40 = vsub.s32 0, %v416_v38  ;;  %v147_v42 = vsub.s32 1, %v416_v38 }
  0x23   :  { %v54_v13 = vrot.slane %v53_v9, 2  ;;  %v60_v14 = vmax.f32 %v58_v7, %v59_v10  ;;  %v68_v15 = vrot.slane %v67_v11, 2  ;;  %v74_v20 = vmax.f32 %v72_v12, %v73_v16  ;;  %p339_p13 = por %p338_p12, %p337_p11 }
  0x24   :  { %v144_v43 = vrot.slane %v42_v41, %v143_v40  ;;  %v148_v45 = vrot.slane %v42_v41, %v147_v42  ;;  %v152_v46 = vrot.slane %v43_v44, %v143_v40  ;;  %v156_v47 = vrot.slane %v43_v44, %v147_v42 }
  0x25   :  { %v55_v17 = vmax.f32 %v53_v9, %v54_v13  ;;  %v61_v18 = vrot.slane %v60_v14, 2  ;;  %v69_v19 = vmax.f32 %v67_v11, %v68_v15  ;;  %v75_v24 = vrot.slane %v74_v20, 2  ;;  %p340_p0 = pnand %p339_p13, %p333_p10 }
  0x26   :  { %vm157_vm1 = vcmp.eq.s32.totalorder %v416_v38, %v144_v43  ;;  %vm158_vm2 = vcmp.eq.s32.totalorder %v416_v38, %v148_v45  ;;  %vm159_vm3 = vcmp.eq.s32.totalorder %v416_v38, %v152_v46  ;;  %vm160_vm4 = vcmp.eq.s32.totalorder %v416_v38, %v156_v47 }
  0x27   :  { %v56_v21 = vrot.slane %v55_v17, 1  ;;  %v62_v22 = vmax.f32 %v60_v14, %v61_v18  ;;  %v70_v23 = vrot.slane %v69_v19, 1  ;;  %v76_v27 = vmax.f32 %v74_v20, %v75_v24 }
  0x28   :  { %v161_v52 = vsel %vm157_vm1, %v40_v0, 0.0  ;;  %v162_v55 = vsel %vm158_vm2, %v46_v2, 0.0  ;;  %v163_v62 = vsel %vm159_vm3, %v390_v1, 0.0  ;;  %v164_v7 = vsel %vm160_vm4, %v395_v5, 0.0 }
  0x29   :  { %v402_v25 = vmax.f32 %v55_v17, %v56_v21  ;;  %v63_v26 = vrot.slane %v62_v22, 1  ;;  %v406_v29 = vmax.f32 %v69_v19, %v70_v23  ;;  %v77_v30 = vrot.slane %v76_v27, 1 }
  0x2a   :  { %v165_v60 = vsel %vm50_vm0, %v161_v52, 0.0  ;;  %v172_v4 = vsel %vm50_vm0, %v162_v55, 0.0  ;;  %v179_v11 = vsel %vm50_vm0, %v163_v62, 0.0  ;;  %v186_v16 = vsel %vm50_vm0, %v164_v7, 0.0 }
  0x2b   :  { %v404_v28 = vmax.f32 %v62_v22, %v63_v26  ;;  %v410_v32 = vmax.f32 %v76_v27, %v77_v30  ;;  %v166_v10 = vrot.slane %v165_v60, 4  ;;  %v180_v19 = vrot.slane %v179_v11, 4 }
  0x2c   :  { %v187_v24 = vrot.slane %v186_v16, 4 }
  0x2d   :  { %v83_v31 = vcombine.low %v402_v25, %v404_v28  ;;  %v84_v35 = vcombine.low %v406_v29, %v410_v32  ;;  %v167_v22 = vadd.f32 %v166_v10, %v165_v60 }
  0x2f   :  { %v87_v33 = vsub.f32 %v40_v0, %v83_v31  ;;  %v88_v37 = vsub.f32 %v390_v1, %v84_v35  ;;  %v173_v1 = vrot.slane %v172_v4, 4  ;;  %v168_v35 = vrot.slane %v167_v22, 2 }
  0x31   :  { %v89_v36 = vmul.f32 1.442695, %v87_v33  ;;  %v91_v39 = vmul.f32 1.442695, %v88_v37  ;;  %v174_v27 = vadd.f32 %v173_v1, %v172_v4  ;;  %v181_v33 = vadd.f32 %v180_v19, %v179_v11 }
  0x32   :  { %v188_v37 = vadd.f32 %v187_v24, %v186_v16  ;;  %v169_v41 = vadd.f32 %v168_v35, %v167_v22 }
  0x33   :  { %280 = vpow2.f32 %v89_v36  ;;  %v182_v40 = vrot.slane %v181_v33, 2 }
  0x34   :  { %282 = vpow2.f32 %v91_v39  ;;  %v175_v39 = vrot.slane %v174_v27, 2  ;;  %v189_v42 = vrot.slane %v188_v37, 2  ;;  %v170_v45 = vrot.slane %v169_v41, 1 }
  0x35   :  { %v183_v44 = vadd.f32 %v182_v40, %v181_v33 }
  0x36   :  { %v176_v43 = vadd.f32 %v175_v39, %v174_v27  ;;  %v190_v46 = vadd.f32 %v189_v42, %v188_v37 }
  0x38   :  { %v177_v47 = vrot.slane %v176_v43, 1  ;;  %v191_v55 = vrot.slane %v190_v46, 1 }
  0x40   :  { %v281_v48 = vpop.eup %280 }
  0x41   :  { %v95_v49 = vcombine.high %v281_v48, %v281_v48  ;;  %v99_v50 = vsel %vm50_vm0, %v281_v48, 0.0  ;;  %v283_v53 = vpop.eup %282  ;;  %v364_v48 = vmov 1966171168  }
  0x42   :  { %v100_v51 = vrot.slane %v99_v50, 4  ;;  %v96_v58 = vcombine.high %v283_v53, %v283_v53  ;;  %v113_v59 = vsel %vm50_vm0, %v283_v53, 0.0  ;;  %v171_v53 = vadd.f32 %v170_v45, %v169_v41 }
  0x43   :  { %v106_v54 = vsel %vm50_vm0, %v95_v49, 0.0  ;;  %v114_v61 = vrot.slane %v113_v59, 4  ;;  %v216_v49 = vunpack.c.l.s4 %v364_v48 }
  0x44   :  { %v101_v56 = vadd.f32 %v100_v51, %v99_v50  ;;  %v107_v57 = vrot.slane %v106_v54, 4  ;;  %v120_v3 = vsel %vm50_vm0, %v96_v58, 0.0  ;;  %v184_v51 = vrot.slane %v183_v44, 1 }
  0x45   :  { %v115_v6 = vadd.f32 %v114_v61, %v113_v59  ;;  %v121_v2 = vrot.slane %v120_v3, 4  ;;  %v178_v59 = vadd.f32 %v177_v47, %v176_v43  ;;  %v217_v60 = vunpack.c.0.s8 %v216_v49 }
  0x46   :  { %v102_v63 = vrot.slane %v101_v56, 2  ;;  %v108_v0 = vadd.f32 %v107_v57, %v106_v54  ;;  %v185_v62 = vadd.f32 %v184_v51, %v183_v44 }
  0x47   :  { %v116_v12 = vrot.slane %v115_v6, 2  ;;  %v122_v13 = vadd.f32 %v121_v2, %v120_v3  ;;  %v192_v2 = vadd.f32 %v191_v55, %v190_v46 }
  0x48   :  { %v103_v8 = vadd.f32 %v102_v63, %v101_v56  ;;  %v109_v9 = vrot.slane %v108_v0, 2 }
  0x49   :  { %v117_v17 = vadd.f32 %v116_v12, %v115_v6  ;;  %v123_v18 = vrot.slane %v122_v13, 2 }
  0x4a   :  { %v104_v14 = vrot.slane %v103_v8, 1  ;;  %v110_v15 = vadd.f32 %v109_v9, %v108_v0 }
  0x4b   :  { %v118_v23 = vrot.slane %v117_v17, 1  ;;  %v124_v5 = vadd.f32 %v123_v18, %v122_v13 }
  0x4c   :  { %v105_v20 = vadd.f32 %v104_v14, %v103_v8  ;;  %v111_v21 = vrot.slane %v110_v15, 1  ;;  %v220_v8 = vsub.s32 %v217_v60, %v416_v38 }
  0x4d   :  { %v119_v30 = vadd.f32 %v118_v23, %v117_v17  ;;  %v125_v31 = vrot.slane %v124_v5, 1 }
  0x4e   :  { %v112_v26 = vadd.f32 %v111_v21, %v110_v15  ;;  %284 = vlog2.f32 %v105_v20 }
  0x4f   :  { %v126_v36 = vadd.f32 %v125_v31, %v124_v5 }
  0x50   :  { %286 = vlog2.f32 %v112_v26 }
  0x51   :  { %288 = vlog2.f32 %v119_v30 }
  0x52   :  { %290 = vlog2.f32 %v126_v36 }
  0x5b   :  { %v285_v50 = vpop.eup %284 }
  0x5c   :  { %v128_v52 = vmul.f32 0.6931472, %v285_v50 }
  0x5d   :  { %v287_v54 = vpop.eup %286 }
  0x5e   :  { %v289_v56 = vpop.eup %288  ;;  %v130_v57 = vmul.f32 0.6931472, %v287_v54  ;;  %v135_v58 = vadd.f32 %v128_v52, %v402_v25 }
  0x5f   :  { %v132_v61 = vmul.f32 0.6931472, %v289_v56  ;;  %v291_v63 = vpop.eup %290 }
  0x60   :  { %v136_v0 = vadd.f32 %v130_v57, %v404_v28  ;;  %v193_v3 = vsub.f32 %v135_v58, %v171_v53  ;;  %v134_v4 = vmul.f32 0.6931472, %v291_v63 }
  0x61   :  { %v137_v6 = vadd.f32 %v132_v61, %v406_v29 }
  0x62   :  { %v194_v7 = vsub.f32 %v136_v0, %v178_v59  ;;  %v138_v9 = vadd.f32 %v134_v4, %v410_v32 }
  0x63   :  { %v195_v10 = vsub.f32 %v137_v6, %v185_v62 }
  0x64   :  { %v214_v11 = vcombine.low %v193_v3, %v194_v7  ;;  %v196_v25 = vsub.f32 %v138_v9, %v192_v2 }
  0x66   :  { %v221_v12 = vrot.slane %v214_v11, %v220_v8  ;;  %v229_v13 = vcombine.low %v195_v10, %v196_v25 }
  0x68   :  { %v228_v14 = vrot.slane %v221_v12, %v220_v8  ;;  %v236_v28 = vrot.slane %v229_v13, %v220_v8 }
  0x6a   :  { %250 = vst.msk [vmem:[#allocation7] sm:$0x3] %vm248_vm5, %v228_v14  ;;  %v243_v15 = vrot.slane %v236_v28, %v220_v8 }
  0x6c   :  { %251 = vst.msk [vmem:[#allocation7 + $0x2] sm:$0x3] %vm248_vm5, %v243_v15 }
  0x6d   :  { %343 = shalt.err (!%p340_p0)
}
  0x6e   :  { %263 = dma.vmem_to_hbm [thread:$0]  %s258_s1, 64, %s448_s2, [#allocation4], %s362_s19, %s362_s19, %s363_s20  }
  0x6f   :  { %356 = dma.done.wait [#allocation4], 64  }
  0x70   :  { %357 = vsyncadd [#allocation4], 4294967232 }
  0x71   :  { %267 = vsyncpa [#allocation3], 1 }
  0x72   :  { %268 = vsyncpa [#allocation6], 1 }
  0x73   :  { %269 = vsyncpa [#allocation4], 1 }

</bundles_post_ra>
